<compile_context>
chip_gen: v6e
topology: v6e:2x2x1
jax: 0.10.0
libtpu: 0.0.40
codegen_flags: <defaults>
</compile_context>

<pallas_src>
import functools

import jax
import jax.numpy as jnp
from jax.experimental import pallas as pl
from jax.experimental.pallas import tpu as pltpu


# ------------------------------- fused kernel --------------------------------
def _rpn_trainer_kernel(packed_ref, out_ref, *, batch, num_targets, num_anchors):
    lanes = batch * num_anchors          # one lane per (b, a); 128 at the toy shape
    t4 = num_targets * 4
    r_anc = t4                           # rows [r_anc, r_anc+4): anchors y1,x1,y2,x2
    r_reg = t4 + 4                       # rows [r_reg, r_reg+4): reg     y1,x1,y2,x2
    r_cls = t4 + 8                       # row   r_cls          : cls logits

    ay1 = packed_ref[r_anc + 0:r_anc + 1, :]
    ax1 = packed_ref[r_anc + 1:r_anc + 2, :]
    ay2 = packed_ref[r_anc + 2:r_anc + 3, :]
    ax2 = packed_ref[r_anc + 3:r_anc + 4, :]
    area_a = (ay2 - ay1) * (ax2 - ax1)                       # (1, lanes)

    # ---- match targets to anchors: running max over targets (first-index ties) ----
    best_iou = jnp.full((1, lanes), -1.0, dtype=jnp.float32)
    best_t = jnp.zeros((4, lanes), dtype=jnp.float32)        # matched target coords
    for t in range(num_targets):                             # static unroll: T is tiny
        r = 4 * t
        ty1 = packed_ref[r + 0:r + 1, :]
        tx1 = packed_ref[r + 1:r + 2, :]
        ty2 = packed_ref[r + 2:r + 3, :]
        tx2 = packed_ref[r + 3:r + 4, :]
        ih = jnp.maximum(jnp.minimum(ay2, ty2) - jnp.maximum(ay1, ty1), 0.0)
        iw = jnp.maximum(jnp.minimum(ax2, tx2) - jnp.maximum(ax1, tx1), 0.0)
        inter = ih * iw
        area_t = (ty2 - ty1) * (tx2 - tx1)
        # exact divide (not approx reciprocal): keeps 0.5-threshold / tie behaviour
        iou_t = inter / (area_a + area_t - inter + 1e-8)     # (1, lanes)
        better = iou_t > best_iou                            # strict > : first index wins
        best_iou = jnp.where(better, iou_t, best_iou)
        bf = better.astype(jnp.float32)                      # (1, lanes)
        # exact lerp-select of the whole (4, lanes) target-coordinate plane
        best_t = bf * packed_ref[r:r + 4, :] + (1.0 - bf) * best_t

    pos = (best_iou > 0.5).astype(jnp.float32)               # (1, lanes)

    # ---- BCE-with-logits over ALL anchors: label 1 for positives, 0 otherwise ----
    # (the 128-pos / (256-B)-neg caps never bind at B*A <= 128, so it is a plain mean)
    x = packed_ref[r_cls:r_cls + 1, :]
    bce = jnp.maximum(x, 0.0) - x * pos + jnp.log(1.0 + jnp.exp(-jnp.abs(x)))

    # ---- SmoothL1(reg, matched_target - anchor), all 4 coords at once, pos-masked ----
    resid = packed_ref[r_reg:r_reg + 4, :] - (best_t - packed_ref[r_anc:r_anc + 4, :])
    ar = jnp.abs(resid)
    sl1 = jnp.where(ar < 1.0, 0.5 * resid * resid, ar - 0.5) * pos   # (4, lanes)

    # ---- deferred reductions: exactly three cross-lane sums ----
    bce_sum = jnp.sum(bce)
    sl1_sum = jnp.sum(sl1)
    n_pos = jnp.sum(pos)

    cls_loss = bce_sum * (1.0 / lanes)
    # SmoothL1Loss(reduction='mean') divides by 4*n_pos; the module then returns
    # reg_loss / 4 on top of that -> two divisions by 4, matching the reference.
    # TODO(synk): PyTorch SmoothL1Loss over an empty positive set yields NaN; we
    #             return 0.0 for the zero-positive case instead.
    reg_loss = jnp.where(n_pos > 0.0,
                         sl1_sum / jnp.maximum(4.0 * n_pos, 1.0),
                         0.0) * 0.25

    # Scalar SMEM output: 8 bytes, no vector epilogue, no VMEM output DMA.
    out_ref[0, 0] = cls_loss
    out_ref[0, 1] = reg_loss


# ------------------------------- wrapper --------------------------------------
def rpn_trainer_forward(reg, cls, anchors, targets):
    """RPNTrainer.forward(reg (B,A,4), cls (B,A), anchors (A,4), targets (B,T,4))
       -> (cls_loss, reg_loss / 4), computed in a single fused Pallas kernel."""
    batch, num_anchors, _ = reg.shape
    num_targets = targets.shape[1]
    lanes = batch * num_anchors

    if lanes > 128:
        # TODO(synk): the module's ragged truncation (cls[mask][:128],
        # cls[~mask][:256-B]) is not emulated; it never binds at these shapes.  At
        # production anchor counts this would also need a grid over the anchor axis.
        raise NotImplementedError("positive/negative sampling caps would bind")

    # Single lane-dense packed slab (layout plumbing only, fused into one tiny HLO):
    #   rows [0, 4T)      : targets[b,t,c] broadcast over anchors  (row t*4+c)
    #   rows [4T, 4T+4)   : anchors coords tiled over batch        (lane b*A+a)
    #   rows [4T+4, 4T+8) : reg coords, coordinate-major           (lane b*A+a)
    #   row   4T+8        : cls logits                             (lane b*A+a)
    tgt_rows = jnp.broadcast_to(
        jnp.transpose(targets, (1, 2, 0))[:, :, :, None],
        (num_targets, 4, batch, num_anchors)).reshape(num_targets * 4, lanes)
    anc_rows = jnp.tile(jnp.transpose(anchors, (1, 0)), (1, batch))        # (4, B*A)
    reg_rows = jnp.transpose(reg, (2, 0, 1)).reshape(4, lanes)             # (4, B*A)
    cls_row = cls.reshape(1, lanes)                                        # (1, B*A)
    packed = jnp.concatenate([tgt_rows, anc_rows, reg_rows, cls_row],
                             axis=0).astype(jnp.float32)                   # (4T+9, B*A)

    out = pl.pallas_call(
        functools.partial(_rpn_trainer_kernel, batch=batch,
                          num_targets=num_targets, num_anchors=num_anchors),
        in_specs=[pl.BlockSpec(memory_space=pltpu.MemorySpace.VMEM)],
        out_specs=pl.BlockSpec(memory_space=pltpu.MemorySpace.SMEM),
        out_shape=jax.ShapeDtypeStruct((1, 2), jnp.float32),
    )(packed)

    return out[0, 0], out[0, 1]


# ------------------------------- main ------------------------------------------
if __name__ == "__main__":
    BATCH, NUM_TARGETS = 2, 4
    FM = 4                       # 4x4 feature-map grid
    A_PER = 4                    # anchors per cell
    NUM_ANCHORS = FM * FM * A_PER
    REDUCTION = 4
    HALF_SIZES = (3.0, 5.0, 7.0, 9.0)

    # deterministic anchor grid (A, 4) in [y1, x1, y2, x2] image coordinates
    ys = (jnp.arange(FM, dtype=jnp.float32) + 0.5) * REDUCTION
    xs = (jnp.arange(FM, dtype=jnp.float32) + 0.5) * REDUCTION
    cy, cx = jnp.meshgrid(ys, xs, indexing="ij")
    anchors = jnp.stack(
        [jnp.stack([cy - s, cx - s, cy + s, cx + s], axis=-1) for s in HALF_SIZES],
        axis=2).reshape(-1, 4)

    key = jax.random.PRNGKey(0)
    k_reg, k_cls, k_cy, k_cx, k_hs = jax.random.split(key, 5)
    reg = 0.1 * jax.random.normal(k_reg, (BATCH, NUM_ANCHORS, 4), jnp.float32)
    cls = jax.random.normal(k_cls, (BATCH, NUM_ANCHORS), jnp.float32)
    tcy = jax.random.uniform(k_cy, (BATCH, NUM_TARGETS), minval=4.0, maxval=12.0)
    tcx = jax.random.uniform(k_cx, (BATCH, NUM_TARGETS), minval=4.0, maxval=12.0)
    ths = jax.random.uniform(k_hs, (BATCH, NUM_TARGETS), minval=2.5, maxval=6.0)
    targets = jnp.stack([tcy - ths, tcx - ths, tcy + ths, tcx + ths], axis=-1)

    fwd = jax.jit(rpn_trainer_forward)
    cls_loss, reg_loss = fwd(reg, cls, anchors, targets)
    jax.block_until_ready((cls_loss, reg_loss))
    print("KERNEL_OK")
</pallas_src>

<mosaic_0001>
module attributes {stable_mosaic.version = 11 : i64} {
  func.func @_rpn_trainer_kernel(%arg0: memref<25x128xf32, #tpu.memory_space<vmem>>, %arg1: memref<1x2xf32, #tpu.memory_space<smem>>) attributes {dimension_semantics = [], scalar_prefetch = 0 : i64, scratch_operands = 0 : i64, tpu.core_type = #tpu.core_type<tc>} {
    %c16 = arith.constant 16 : index
    %c0 = arith.constant 0 : index
    %0 = vector.load %arg0[%c16, %c0] : memref<25x128xf32, #tpu.memory_space<vmem>>, vector<1x128xf32>
    %c17 = arith.constant 17 : index
    %c0_0 = arith.constant 0 : index
    %1 = vector.load %arg0[%c17, %c0_0] : memref<25x128xf32, #tpu.memory_space<vmem>>, vector<1x128xf32>
    %c18 = arith.constant 18 : index
    %c0_1 = arith.constant 0 : index
    %2 = vector.load %arg0[%c18, %c0_1] : memref<25x128xf32, #tpu.memory_space<vmem>>, vector<1x128xf32>
    %c19 = arith.constant 19 : index
    %c0_2 = arith.constant 0 : index
    %3 = vector.load %arg0[%c19, %c0_2] : memref<25x128xf32, #tpu.memory_space<vmem>>, vector<1x128xf32>
    %4 = arith.subf %2, %0 : vector<1x128xf32>
    %5 = arith.subf %3, %1 : vector<1x128xf32>
    %6 = arith.mulf %4, %5 : vector<1x128xf32>
    %cst = arith.constant -1.000000e+00 : f32
    %7 = vector.broadcast %cst : f32 to vector<1x128xf32>
    %cst_3 = arith.constant 0.000000e+00 : f32
    %8 = vector.broadcast %cst_3 : f32 to vector<4x128xf32>
    %c0_4 = arith.constant 0 : index
    %c0_5 = arith.constant 0 : index
    %9 = vector.load %arg0[%c0_4, %c0_5] : memref<25x128xf32, #tpu.memory_space<vmem>>, vector<1x128xf32>
    %c1 = arith.constant 1 : index
    %c0_6 = arith.constant 0 : index
    %10 = vector.load %arg0[%c1, %c0_6] : memref<25x128xf32, #tpu.memory_space<vmem>>, vector<1x128xf32>
    %c2 = arith.constant 2 : index
    %c0_7 = arith.constant 0 : index
    %11 = vector.load %arg0[%c2, %c0_7] : memref<25x128xf32, #tpu.memory_space<vmem>>, vector<1x128xf32>
    %c3 = arith.constant 3 : index
    %c0_8 = arith.constant 0 : index
    %12 = vector.load %arg0[%c3, %c0_8] : memref<25x128xf32, #tpu.memory_space<vmem>>, vector<1x128xf32>
    %13 = arith.minimumf %2, %11 : vector<1x128xf32>
    %14 = arith.maximumf %0, %9 : vector<1x128xf32>
    %15 = arith.subf %13, %14 : vector<1x128xf32>
    %cst_9 = arith.constant 0.000000e+00 : f32
    %16 = vector.broadcast %cst_9 : f32 to vector<1x128xf32>
    %17 = arith.maximumf %15, %16 : vector<1x128xf32>
    %18 = arith.minimumf %3, %12 : vector<1x128xf32>
    %19 = arith.maximumf %1, %10 : vector<1x128xf32>
    %20 = arith.subf %18, %19 : vector<1x128xf32>
    %cst_10 = arith.constant 0.000000e+00 : f32
    %21 = vector.broadcast %cst_10 : f32 to vector<1x128xf32>
    %22 = arith.maximumf %20, %21 : vector<1x128xf32>
    %23 = arith.mulf %17, %22 : vector<1x128xf32>
    %24 = arith.subf %11, %9 : vector<1x128xf32>
    %25 = arith.subf %12, %10 : vector<1x128xf32>
    %26 = arith.mulf %24, %25 : vector<1x128xf32>
    %27 = arith.addf %6, %26 : vector<1x128xf32>
    %28 = arith.subf %27, %23 : vector<1x128xf32>
    %cst_11 = arith.constant 9.99999993E-9 : f32
    %29 = vector.broadcast %cst_11 : f32 to vector<1x128xf32>
    %30 = arith.addf %28, %29 : vector<1x128xf32>
    %31 = arith.divf %23, %30 : vector<1x128xf32>
    %32 = arith.cmpf ogt, %31, %7 : vector<1x128xf32>
    %33 = arith.select %32, %31, %7 : vector<1x128xi1>, vector<1x128xf32>
    %34 = arith.extui %32 : vector<1x128xi1> to vector<1x128xi32>
    %35 = arith.sitofp %34 : vector<1x128xi32> to vector<1x128xf32>
    %c0_12 = arith.constant 0 : index
    %c0_13 = arith.constant 0 : index
    %36 = vector.load %arg0[%c0_12, %c0_13] : memref<25x128xf32, #tpu.memory_space<vmem>>, vector<4x128xf32>
    %37 = vector.broadcast %35 : vector<1x128xf32> to vector<4x128xf32>
    %38 = arith.mulf %37, %36 : vector<4x128xf32>
    %cst_14 = arith.constant 1.000000e+00 : f32
    %39 = vector.broadcast %cst_14 : f32 to vector<1x128xf32>
    %40 = arith.subf %39, %35 : vector<1x128xf32>
    %41 = vector.broadcast %40 : vector<1x128xf32> to vector<4x128xf32>
    %42 = arith.mulf %41, %8 : vector<4x128xf32>
    %43 = arith.addf %38, %42 : vector<4x128xf32>
    %c4 = arith.constant 4 : index
    %c0_15 = arith.constant 0 : index
    %44 = vector.load %arg0[%c4, %c0_15] : memref<25x128xf32, #tpu.memory_space<vmem>>, vector<1x128xf32>
    %c5 = arith.constant 5 : index
    %c0_16 = arith.constant 0 : index
    %45 = vector.load %arg0[%c5, %c0_16] : memref<25x128xf32, #tpu.memory_space<vmem>>, vector<1x128xf32>
    %c6 = arith.constant 6 : index
    %c0_17 = arith.constant 0 : index
    %46 = vector.load %arg0[%c6, %c0_17] : memref<25x128xf32, #tpu.memory_space<vmem>>, vector<1x128xf32>
    %c7 = arith.constant 7 : index
    %c0_18 = arith.constant 0 : index
    %47 = vector.load %arg0[%c7, %c0_18] : memref<25x128xf32, #tpu.memory_space<vmem>>, vector<1x128xf32>
    %48 = arith.minimumf %2, %46 : vector<1x128xf32>
    %49 = arith.maximumf %0, %44 : vector<1x128xf32>
    %50 = arith.subf %48, %49 : vector<1x128xf32>
    %cst_19 = arith.constant 0.000000e+00 : f32
    %51 = vector.broadcast %cst_19 : f32 to vector<1x128xf32>
    %52 = arith.maximumf %50, %51 : vector<1x128xf32>
    %53 = arith.minimumf %3, %47 : vector<1x128xf32>
    %54 = arith.maximumf %1, %45 : vector<1x128xf32>
    %55 = arith.subf %53, %54 : vector<1x128xf32>
    %cst_20 = arith.constant 0.000000e+00 : f32
    %56 = vector.broadcast %cst_20 : f32 to vector<1x128xf32>
    %57 = arith.maximumf %55, %56 : vector<1x128xf32>
    %58 = arith.mulf %52, %57 : vector<1x128xf32>
    %59 = arith.subf %46, %44 : vector<1x128xf32>
    %60 = arith.subf %47, %45 : vector<1x128xf32>
    %61 = arith.mulf %59, %60 : vector<1x128xf32>
    %62 = arith.addf %6, %61 : vector<1x128xf32>
    %63 = arith.subf %62, %58 : vector<1x128xf32>
    %cst_21 = arith.constant 9.99999993E-9 : f32
    %64 = vector.broadcast %cst_21 : f32 to vector<1x128xf32>
    %65 = arith.addf %63, %64 : vector<1x128xf32>
    %66 = arith.divf %58, %65 : vector<1x128xf32>
    %67 = arith.cmpf ogt, %66, %33 : vector<1x128xf32>
    %68 = arith.select %67, %66, %33 : vector<1x128xi1>, vector<1x128xf32>
    %69 = arith.extui %67 : vector<1x128xi1> to vector<1x128xi32>
    %70 = arith.sitofp %69 : vector<1x128xi32> to vector<1x128xf32>
    %c4_22 = arith.constant 4 : index
    %c0_23 = arith.constant 0 : index
    %71 = vector.load %arg0[%c4_22, %c0_23] : memref<25x128xf32, #tpu.memory_space<vmem>>, vector<4x128xf32>
    %72 = vector.broadcast %70 : vector<1x128xf32> to vector<4x128xf32>
    %73 = arith.mulf %72, %71 : vector<4x128xf32>
    %cst_24 = arith.constant 1.000000e+00 : f32
    %74 = vector.broadcast %cst_24 : f32 to vector<1x128xf32>
    %75 = arith.subf %74, %70 : vector<1x128xf32>
    %76 = vector.broadcast %75 : vector<1x128xf32> to vector<4x128xf32>
    %77 = arith.mulf %76, %43 : vector<4x128xf32>
    %78 = arith.addf %73, %77 : vector<4x128xf32>
    %c8 = arith.constant 8 : index
    %c0_25 = arith.constant 0 : index
    %79 = vector.load %arg0[%c8, %c0_25] : memref<25x128xf32, #tpu.memory_space<vmem>>, vector<1x128xf32>
    %c9 = arith.constant 9 : index
    %c0_26 = arith.constant 0 : index
    %80 = vector.load %arg0[%c9, %c0_26] : memref<25x128xf32, #tpu.memory_space<vmem>>, vector<1x128xf32>
    %c10 = arith.constant 10 : index
    %c0_27 = arith.constant 0 : index
    %81 = vector.load %arg0[%c10, %c0_27] : memref<25x128xf32, #tpu.memory_space<vmem>>, vector<1x128xf32>
    %c11 = arith.constant 11 : index
    %c0_28 = arith.constant 0 : index
    %82 = vector.load %arg0[%c11, %c0_28] : memref<25x128xf32, #tpu.memory_space<vmem>>, vector<1x128xf32>
    %83 = arith.minimumf %2, %81 : vector<1x128xf32>
    %84 = arith.maximumf %0, %79 : vector<1x128xf32>
    %85 = arith.subf %83, %84 : vector<1x128xf32>
    %cst_29 = arith.constant 0.000000e+00 : f32
    %86 = vector.broadcast %cst_29 : f32 to vector<1x128xf32>
    %87 = arith.maximumf %85, %86 : vector<1x128xf32>
    %88 = arith.minimumf %3, %82 : vector<1x128xf32>
    %89 = arith.maximumf %1, %80 : vector<1x128xf32>
    %90 = arith.subf %88, %89 : vector<1x128xf32>
    %cst_30 = arith.constant 0.000000e+00 : f32
    %91 = vector.broadcast %cst_30 : f32 to vector<1x128xf32>
    %92 = arith.maximumf %90, %91 : vector<1x128xf32>
    %93 = arith.mulf %87, %92 : vector<1x128xf32>
    %94 = arith.subf %81, %79 : vector<1x128xf32>
    %95 = arith.subf %82, %80 : vector<1x128xf32>
    %96 = arith.mulf %94, %95 : vector<1x128xf32>
    %97 = arith.addf %6, %96 : vector<1x128xf32>
    %98 = arith.subf %97, %93 : vector<1x128xf32>
    %cst_31 = arith.constant 9.99999993E-9 : f32
    %99 = vector.broadcast %cst_31 : f32 to vector<1x128xf32>
    %100 = arith.addf %98, %99 : vector<1x128xf32>
    %101 = arith.divf %93, %100 : vector<1x128xf32>
    %102 = arith.cmpf ogt, %101, %68 : vector<1x128xf32>
    %103 = arith.select %102, %101, %68 : vector<1x128xi1>, vector<1x128xf32>
    %104 = arith.extui %102 : vector<1x128xi1> to vector<1x128xi32>
    %105 = arith.sitofp %104 : vector<1x128xi32> to vector<1x128xf32>
    %c8_32 = arith.constant 8 : index
    %c0_33 = arith.constant 0 : index
    %106 = vector.load %arg0[%c8_32, %c0_33] : memref<25x128xf32, #tpu.memory_space<vmem>>, vector<4x128xf32>
    %107 = vector.broadcast %105 : vector<1x128xf32> to vector<4x128xf32>
    %108 = arith.mulf %107, %106 : vector<4x128xf32>
    %cst_34 = arith.constant 1.000000e+00 : f32
    %109 = vector.broadcast %cst_34 : f32 to vector<1x128xf32>
    %110 = arith.subf %109, %105 : vector<1x128xf32>
    %111 = vector.broadcast %110 : vector<1x128xf32> to vector<4x128xf32>
    %112 = arith.mulf %111, %78 : vector<4x128xf32>
    %113 = arith.addf %108, %112 : vector<4x128xf32>
    %c12 = arith.constant 12 : index
    %c0_35 = arith.constant 0 : index
    %114 = vector.load %arg0[%c12, %c0_35] : memref<25x128xf32, #tpu.memory_space<vmem>>, vector<1x128xf32>
    %c13 = arith.constant 13 : index
    %c0_36 = arith.constant 0 : index
    %115 = vector.load %arg0[%c13, %c0_36] : memref<25x128xf32, #tpu.memory_space<vmem>>, vector<1x128xf32>
    %c14 = arith.constant 14 : index
    %c0_37 = arith.constant 0 : index
    %116 = vector.load %arg0[%c14, %c0_37] : memref<25x128xf32, #tpu.memory_space<vmem>>, vector<1x128xf32>
    %c15 = arith.constant 15 : index
    %c0_38 = arith.constant 0 : index
    %117 = vector.load %arg0[%c15, %c0_38] : memref<25x128xf32, #tpu.memory_space<vmem>>, vector<1x128xf32>
    %118 = arith.minimumf %2, %116 : vector<1x128xf32>
    %119 = arith.maximumf %0, %114 : vector<1x128xf32>
    %120 = arith.subf %118, %119 : vector<1x128xf32>
    %cst_39 = arith.constant 0.000000e+00 : f32
    %121 = vector.broadcast %cst_39 : f32 to vector<1x128xf32>
    %122 = arith.maximumf %120, %121 : vector<1x128xf32>
    %123 = arith.minimumf %3, %117 : vector<1x128xf32>
    %124 = arith.maximumf %1, %115 : vector<1x128xf32>
    %125 = arith.subf %123, %124 : vector<1x128xf32>
    %cst_40 = arith.constant 0.000000e+00 : f32
    %126 = vector.broadcast %cst_40 : f32 to vector<1x128xf32>
    %127 = arith.maximumf %125, %126 : vector<1x128xf32>
    %128 = arith.mulf %122, %127 : vector<1x128xf32>
    %129 = arith.subf %116, %114 : vector<1x128xf32>
    %130 = arith.subf %117, %115 : vector<1x128xf32>
    %131 = arith.mulf %129, %130 : vector<1x128xf32>
    %132 = arith.addf %6, %131 : vector<1x128xf32>
    %133 = arith.subf %132, %128 : vector<1x128xf32>
    %cst_41 = arith.constant 9.99999993E-9 : f32
    %134 = vector.broadcast %cst_41 : f32 to vector<1x128xf32>
    %135 = arith.addf %133, %134 : vector<1x128xf32>
    %136 = arith.divf %128, %135 : vector<1x128xf32>
    %137 = arith.cmpf ogt, %136, %103 : vector<1x128xf32>
    %138 = arith.select %137, %136, %103 : vector<1x128xi1>, vector<1x128xf32>
    %139 = arith.extui %137 : vector<1x128xi1> to vector<1x128xi32>
    %140 = arith.sitofp %139 : vector<1x128xi32> to vector<1x128xf32>
    %c12_42 = arith.constant 12 : index
    %c0_43 = arith.constant 0 : index
    %141 = vector.load %arg0[%c12_42, %c0_43] : memref<25x128xf32, #tpu.memory_space<vmem>>, vector<4x128xf32>
    %142 = vector.broadcast %140 : vector<1x128xf32> to vector<4x128xf32>
    %143 = arith.mulf %142, %141 : vector<4x128xf32>
    %cst_44 = arith.constant 1.000000e+00 : f32
    %144 = vector.broadcast %cst_44 : f32 to vector<1x128xf32>
    %145 = arith.subf %144, %140 : vector<1x128xf32>
    %146 = vector.broadcast %145 : vector<1x128xf32> to vector<4x128xf32>
    %147 = arith.mulf %146, %113 : vector<4x128xf32>
    %148 = arith.addf %143, %147 : vector<4x128xf32>
    %cst_45 = arith.constant 5.000000e-01 : f32
    %149 = vector.broadcast %cst_45 : f32 to vector<1x128xf32>
    %150 = arith.cmpf ogt, %138, %149 : vector<1x128xf32>
    %151 = arith.extui %150 : vector<1x128xi1> to vector<1x128xi32>
    %152 = arith.sitofp %151 : vector<1x128xi32> to vector<1x128xf32>
    %c24 = arith.constant 24 : index
    %c0_46 = arith.constant 0 : index
    %153 = vector.load %arg0[%c24, %c0_46] : memref<25x128xf32, #tpu.memory_space<vmem>>, vector<1x128xf32>
    %cst_47 = arith.constant 0.000000e+00 : f32
    %154 = vector.broadcast %cst_47 : f32 to vector<1x128xf32>
    %155 = arith.maximumf %153, %154 : vector<1x128xf32>
    %156 = arith.mulf %153, %152 : vector<1x128xf32>
    %157 = arith.subf %155, %156 : vector<1x128xf32>
    %158 = math.absf %153 : vector<1x128xf32>
    %cst_48 = arith.constant 0.000000e+00 : f32
    %159 = vector.broadcast %cst_48 : f32 to vector<1x128xf32>
    %160 = arith.subf %159, %158 : vector<1x128xf32>
    %161 = math.exp %160 : vector<1x128xf32>
    %cst_49 = arith.constant 1.000000e+00 : f32
    %162 = vector.broadcast %cst_49 : f32 to vector<1x128xf32>
    %163 = arith.addf %162, %161 : vector<1x128xf32>
    %164 = math.log %163 : vector<1x128xf32>
    %165 = arith.addf %157, %164 : vector<1x128xf32>
    %c20 = arith.constant 20 : index
    %c0_50 = arith.constant 0 : index
    %166 = vector.load %arg0[%c20, %c0_50] : memref<25x128xf32, #tpu.memory_space<vmem>>, vector<4x128xf32>
    %c16_51 = arith.constant 16 : index
    %c0_52 = arith.constant 0 : index
    %167 = vector.load %arg0[%c16_51, %c0_52] : memref<25x128xf32, #tpu.memory_space<vmem>>, vector<4x128xf32>
    %168 = arith.subf %148, %167 : vector<4x128xf32>
    %169 = arith.subf %166, %168 : vector<4x128xf32>
    %170 = math.absf %169 : vector<4x128xf32>
    %cst_53 = arith.constant 1.000000e+00 : f32
    %171 = vector.broadcast %cst_53 : f32 to vector<4x128xf32>
    %172 = arith.cmpf olt, %170, %171 : vector<4x128xf32>
    %cst_54 = arith.constant 5.000000e-01 : f32
    %173 = vector.broadcast %cst_54 : f32 to vector<4x128xf32>
    %174 = arith.mulf %173, %169 : vector<4x128xf32>
    %175 = arith.mulf %174, %169 : vector<4x128xf32>
    %cst_55 = arith.constant 5.000000e-01 : f32
    %176 = vector.broadcast %cst_55 : f32 to vector<4x128xf32>
    %177 = arith.subf %170, %176 : vector<4x128xf32>
    %178 = arith.select %172, %175, %177 : vector<4x128xi1>, vector<4x128xf32>
    %179 = vector.broadcast %152 : vector<1x128xf32> to vector<4x128xf32>
    %180 = arith.mulf %178, %179 : vector<4x128xf32>
    %181 = vector.shape_cast %165 : vector<1x128xf32> to vector<1x1x128xf32>
    %cst_56 = arith.constant dense<0.000000e+00> : vector<1xf32>
    %182 = vector.multi_reduction <add>, %181, %cst_56 [1, 2] : vector<1x1x128xf32> to vector<1xf32>
    %183 = vector.shape_cast %182 : vector<1xf32> to vector<1x1x1xf32>
    %184 = vector.extract %183[0, 0, 0] : f32 from vector<1x1x1xf32>
    %185 = vector.shape_cast %180 : vector<4x128xf32> to vector<1x4x128xf32>
    %cst_57 = arith.constant dense<0.000000e+00> : vector<1xf32>
    %186 = vector.multi_reduction <add>, %185, %cst_57 [1, 2] : vector<1x4x128xf32> to vector<1xf32>
    %187 = vector.shape_cast %186 : vector<1xf32> to vector<1x1x1xf32>
    %188 = vector.extract %187[0, 0, 0] : f32 from vector<1x1x1xf32>
    %189 = vector.shape_cast %152 : vector<1x128xf32> to vector<1x1x128xf32>
    %cst_58 = arith.constant dense<0.000000e+00> : vector<1xf32>
    %190 = vector.multi_reduction <add>, %189, %cst_58 [1, 2] : vector<1x1x128xf32> to vector<1xf32>
    %191 = vector.shape_cast %190 : vector<1xf32> to vector<1x1x1xf32>
    %192 = vector.extract %191[0, 0, 0] : f32 from vector<1x1x1xf32>
    %cst_59 = arith.constant 7.812500e-03 : f32
    %193 = arith.mulf %184, %cst_59 : f32
    %cst_60 = arith.constant 0.000000e+00 : f32
    %194 = arith.cmpf ogt, %192, %cst_60 : f32
    %cst_61 = arith.constant 4.000000e+00 : f32
    %195 = arith.mulf %cst_61, %192 : f32
    %cst_62 = arith.constant 1.000000e+00 : f32
    %196 = arith.maximumf %195, %cst_62 : f32
    %197 = arith.divf %188, %196 : f32
    %cst_63 = arith.constant 0.000000e+00 : f32
    %198 = arith.select %194, %197, %cst_63 : f32
    %cst_64 = arith.constant 2.500000e-01 : f32
    %199 = arith.mulf %198, %cst_64 : f32
    %c0_65 = arith.constant 0 : index
    %c0_66 = arith.constant 0 : index
    %200 = memref.load %arg1[%c0_65, %c0_66] : memref<1x2xf32, #tpu.memory_space<smem>>
    memref.store %193, %arg1[%c0_65, %c0_66] : memref<1x2xf32, #tpu.memory_space<smem>>
    %c0_67 = arith.constant 0 : index
    %c1_68 = arith.constant 1 : index
    %201 = memref.load %arg1[%c0_67, %c1_68] : memref<1x2xf32, #tpu.memory_space<smem>>
    memref.store %199, %arg1[%c0_67, %c1_68] : memref<1x2xf32, #tpu.memory_space<smem>>
    return
  }
}

</mosaic_0001>

<bundles_post_ra>
// kernel: rpn_trainer_forward.1
= control target key start
LH: loop header
LB: loop body
LE: loop exit
PB: predicated region body
PF: predicated region fallthrough
CT: control target
= control target key end

     0   :  { %s453_s0 = inlined_call_operand.vmem [shape: f32[25,128], index: 0, kind: input, shape index: {}]   ;;  %s454_s1 = inlined_call_operand.vmem [shape: f32[1,2], index: 1, kind: output, shape index: {}]  }
   0x1   :  { %v320_v0 = vld [vmem:[%s453_s0 + $0x10] sm:$0x1]  ;;  %v325_v1 = vld [vmem:[%s453_s0 + $0x11] sm:$0x1]  ;;  %v330_v2 = vld [vmem:[%s453_s0 + $0x12] sm:$0x1] }
   0x2   :  { %v335_v3 = vld [vmem:[%s453_s0 + $0x13] sm:$0x1]  ;;  %v13_v4 = vsub.f32 %v330_v2, %v320_v0  ;;  %v16_v5 = vld [vmem:[%s453_s0] sm:$0x1]  ;;  %v17_v6 = vld [vmem:[%s453_s0 + $0x1] sm:$0x1] }
   0x3   :  { %v14_v7 = vsub.f32 %v335_v3, %v325_v1  ;;  %v18_v8 = vld [vmem:[%s453_s0 + $0x2] sm:$0x1]  ;;  %v19_v9 = vld [vmem:[%s453_s0 + $0x3] sm:$0x1]  ;;  %v21_v10 = vmax.f32 %v320_v0, %v16_v5  ;;  %v25_v11 = vmax.f32 %v325_v1, %v17_v6  ;;  %v54_v16 = vld [vmem:[%s453_s0 + $0x4] sm:$0x1] }
   0x4   :  { %v20_v12 = vmin.f32 %v330_v2, %v18_v8  ;;  %v24_v13 = vmin.f32 %v335_v3, %v19_v9  ;;  %v29_v14 = vsub.f32 %v18_v8, %v16_v5  ;;  %v30_v15 = vsub.f32 %v19_v9, %v17_v6  ;;  %v55_v17 = vld [vmem:[%s453_s0 + $0x5] sm:$0x1]  ;;  %v56_v19 = vld [vmem:[%s453_s0 + $0x6] sm:$0x1]  ;;  %v57_v20 = vld [vmem:[%s453_s0 + $0x7] sm:$0x1] }
   0x5   :  { %v363_v18 = vmul.f32 %v14_v7, %v13_v4  ;;  %v59_v21 = vmax.f32 %v320_v0, %v54_v16  ;;  %v63_v22 = vmax.f32 %v325_v1, %v55_v17  ;;  %v58_v26 = vmin.f32 %v330_v2, %v56_v19  ;;  %v92_v27 = vld [vmem:[%s453_s0 + $0x8] sm:$0x1]  ;;  %v93_v31 = vld [vmem:[%s453_s0 + $0x9] sm:$0x1]  ;;  %v94_v32 = vld [vmem:[%s453_s0 + $0xa] sm:$0x1] }
   0x6   :  { %v22_v23 = vsub.f32 %v20_v12, %v21_v10  ;;  %v26_v24 = vsub.f32 %v24_v13, %v25_v11  ;;  %v31_v25 = vmul.f32 %v30_v15, %v29_v14  ;;  %v62_v28 = vmin.f32 %v335_v3, %v57_v20  ;;  %v95_v33 = vld [vmem:[%s453_s0 + $0xb] sm:$0x1]  ;;  %v132_v42 = vld [vmem:[%s453_s0 + $0xe] sm:$0x1]  ;;  %v130_v47 = vld [vmem:[%s453_s0 + $0xc] sm:$0x1] }
   0x7   :  { %v67_v29 = vsub.f32 %v56_v19, %v54_v16  ;;  %v68_v30 = vsub.f32 %v57_v20, %v55_v17  ;;  %v60_v37 = vsub.f32 %v58_v26, %v59_v21  ;;  %v96_v40 = vmin.f32 %v330_v2, %v94_v32  ;;  %v133_v48 = vld [vmem:[%s453_s0 + $0xf] sm:$0x1]  ;;  %v131_v53 = vld [vmem:[%s453_s0 + $0xd] sm:$0x1] }
   0x8   :  { %v23_v34 = vmax.f32 %v22_v23, 0.0  ;;  %v27_v35 = vmax.f32 %v26_v24, 0.0  ;;  %v32_v36 = vadd.f32 %v31_v25, %v363_v18  ;;  %v64_v38 = vsub.f32 %v62_v28, %v63_v22 }
   0x9   :  { %v69_v39 = vmul.f32 %v68_v30, %v67_v29  ;;  %v97_v41 = vmax.f32 %v320_v0, %v92_v27  ;;  %v61_v44 = vmax.f32 %v60_v37, 0.0  ;;  %v100_v45 = vmin.f32 %v335_v3, %v95_v33 }
   0xa   :  { %v28_v43 = vmul.f32 %v27_v35, %v23_v34  ;;  %v101_v46 = vmax.f32 %v325_v1, %v93_v31  ;;  %v65_v49 = vmax.f32 %v64_v38, 0.0  ;;  %v105_v52 = vsub.f32 %v94_v32, %v92_v27 }
   0xb   :  { %v70_v50 = vadd.f32 %v69_v39, %v363_v18  ;;  %v98_v51 = vsub.f32 %v96_v40, %v97_v41  ;;  %v106_v56 = vsub.f32 %v95_v33, %v93_v31  ;;  %v134_v57 = vmin.f32 %v330_v2, %v132_v42 }
   0xc   :  { %v33_v54 = vsub.f32 %v32_v36, %v28_v43  ;;  %v102_v55 = vsub.f32 %v100_v45, %v101_v46 }
   0xd   :  { %6 = vsyncpa [#allocation3], 0  ;;  %v66_v58 = vmul.f32 %v65_v49, %v61_v44  ;;  %v99_v59 = vmax.f32 %v98_v51, 0.0  ;;  %v135_v60 = vmax.f32 %v320_v0, %v130_v47  ;;  %v138_v61 = vmin.f32 %v335_v3, %v133_v48  ;;  %v412_v2 = vld [vmem:[%s453_s0 + $0x18] sm:$0x1]  ;;  %s305_s6 = smov 1.0  }
   0xe   :  { %v34_v62 = vadd.f32 1e-08, %v33_v54  ;;  %v103_v63 = vmax.f32 %v102_v55, 0.0  ;;  %v107_v4 = vmul.f32 %v106_v56, %v105_v52  ;;  %v139_v5 = vmax.f32 %v325_v1, %v131_v53  ;;  %v41_v32 = vld [vmem:[%s453_s0] sm:$0xf]  ;;  %s250_s12 = sshll.u32 %s454_s1, 4  ;;  %s251_s12 = int_to_ptr.vmem [resolvable:$true] %s250_s12 }
   0xf   :  { %v71_v6 = vsub.f32 %v70_v50, %v66_v58  ;;  %v136_v7 = vsub.f32 %v134_v57, %v135_v60  ;;  %v143_v8 = vsub.f32 %v132_v42, %v130_v47  ;;  %v144_v9 = vsub.f32 %v133_v48, %v131_v53  ;;  %v79_v41 = vld [vmem:[%s453_s0 + $0x4] sm:$0xf]  ;;  %v117_v54 = vld [vmem:[%s453_s0 + $0x8] sm:$0xf]  ;;  %s290_s14 = scalar_lea.vmem %s251_s12, 16  ;;  %p295_p2 = scmp.lt.s32.totalorder %s251_s12, %s251_s12 }
  0x10   :  { %276 = vrcp.f32 %v34_v62  ;;  %v104_v10 = vmul.f32 %v103_v63, %v99_v59  ;;  %v108_v0 = vadd.f32 %v107_v4, %v363_v18  ;;  %v140_v11 = vsub.f32 %v138_v61, %v139_v5  ;;  %p291_p1 = scmp.ne.s32.totalorder %s251_s12, %s290_s14  ;;  %p296_p3 = scmp.lt.s32.totalorder %s290_s14, %s290_s14 }
  0x11   :  { %v72_v3 = vadd.f32 1e-08, %v71_v6  ;;  %v137_v12 = vmax.f32 %v136_v7, 0.0  ;;  %v145_v13 = vmul.f32 %v144_v9, %v143_v8  ;;  %v175_v1 = vand.u32 2147483647, %v412_v2 }
  0x12   :  { %v109_v14 = vsub.f32 %v108_v0, %v104_v10  ;;  %v141_v15 = vmax.f32 %v140_v11, 0.0  ;;  %v42_v21 = vlaneseq  ;;  %v304_v31 = vmov 0.0   ;;  %v155_v6 = vld [vmem:[%s453_s0 + $0xc] sm:$0xf]  ;;  %p297_p4 = por %p296_p3, %p295_p2 }
  0x13   :  { %278 = vrcp.f32 %v72_v3  ;;  %v146_v16 = vadd.f32 %v145_v13, %v363_v18  ;;  %v176_v20 = vsub.f32 0.0, %v175_v1  ;;  %vm198_vm5 = vcmask 1040384  }
  0x14   :  { %v110_v17 = vadd.f32 1e-08, %v109_v14  ;;  %v142_v19 = vmul.f32 %v141_v15, %v137_v12  ;;  %v43_v25 = vshrl.u32 %v42_v21, 7  ;;  %v172_v3 = vmax.f32 %v412_v2, 0.0  ;;  %v184_v14 = vld [vmem:[%s453_s0 + $0x10] sm:$0xf]  ;;  %p298_p5 = pnand %p297_p4, %p291_p1 }
  0x15   :  { %v177_v23 = vmul.f32 1.442695, %v176_v20  ;;  %vm209_vm7 = vcmask 1043456  }
  0x16   :  { %280 = vrcp.f32 %v110_v17  ;;  %v147_v22 = vsub.f32 %v146_v16, %v142_v19  ;;  %v417_v28 = vsub.s32 0, %v43_v25  ;;  %v183_v16 = vld [vmem:[%s453_s0 + $0x14] sm:$0xf] }
  0x17   :  { %282 = vpow2.f32 %v177_v23 }
  0x18   :  { %v148_v24 = vadd.f32 1e-08, %v147_v22 }
  0x1a   :  { %284 = vrcp.f32 %v148_v24 }
  0x1d   :  { %v277_v26 = vpop.eup %276 }
  0x1e   :  { %v36_v27 = vmul.f32 %v277_v26, %v28_v43 }
  0x20   :  { %v279_v29 = vpop.eup %278  ;;  %vm37_vm0 = vcmp.gt.f32.partialorder %v36_v27, -1.0 }
  0x21   :  { %v38_v30 = vsel %vm37_vm0, %v36_v27, -1.0  ;;  %v259_v18 = vsel %vm37_vm0, 1.0, %v304_v31  ;;  %v74_v33 = vmul.f32 %v279_v29, %v66_v58 }
  0x22   :  { %v45_v34 = vrot.slane %v259_v18, %v417_v28  ;;  %v47_v35 = vsub.f32 1.0, %v259_v18 }
  0x23   :  { %v281_v36 = vpop.eup %280  ;;  %vm75_vm1 = vcmp.gt.f32.partialorder %v74_v33, %v38_v30 }
  0x24   :  { %v46_v37 = vmul.f32 %v45_v34, %v41_v32  ;;  %v51_v38 = vrot.slane %v47_v35, %v417_v28  ;;  %v76_v39 = vsel %vm75_vm1, %v74_v33, %v38_v30  ;;  %v260_v40 = vsel %vm75_vm1, 1.0, %v304_v31  ;;  %v283_v42 = vpop.eup %282 }
  0x25   :  { %v83_v43 = vrot.slane %v260_v40, %v417_v28  ;;  %v85_v44 = vsub.f32 1.0, %v260_v40  ;;  %v112_v45 = vmul.f32 %v281_v36, %v104_v10  ;;  %v179_v47 = vadd.f32 1.0, %v283_v42 }
  0x26   :  { %v52_v46 = vmul.f32 0.0, %v51_v38 }
  0x27   :  { %v285_v48 = vpop.eup %284  ;;  %v84_v49 = vmul.f32 %v83_v43, %v79_v41  ;;  %v89_v50 = vrot.slane %v85_v44, %v417_v28  ;;  %vm113_vm2 = vcmp.gt.f32.partialorder %v112_v45, %v76_v39  ;;  %286 = vlog2.f32 %v179_v47 }
  0x28   :  { %v53_v51 = vadd.f32 %v52_v46, %v46_v37  ;;  %v114_v52 = vsel %vm113_vm2, %v112_v45, %v76_v39  ;;  %v261_v53 = vsel %vm113_vm2, 1.0, %v304_v31  ;;  %v150_v55 = vmul.f32 %v285_v48, %v142_v19 }
  0x29   :  { %v121_v56 = vrot.slane %v261_v53, %v417_v28  ;;  %v123_v57 = vsub.f32 1.0, %v261_v53 }
  0x2a   :  { %v90_v58 = vmul.f32 %v89_v50, %v53_v51  ;;  %vm151_vm3 = vcmp.gt.f32.partialorder %v150_v55, %v114_v52 }
  0x2b   :  { %v122_v59 = vmul.f32 %v121_v56, %v117_v54  ;;  %v127_v60 = vrot.slane %v123_v57, %v417_v28  ;;  %v152_v61 = vsel %vm151_vm3, %v150_v55, %v114_v52  ;;  %v262_v62 = vsel %vm151_vm3, 1.0, %v304_v31 }
  0x2c   :  { %v91_v63 = vadd.f32 %v90_v58, %v84_v49  ;;  %v159_v4 = vrot.slane %v262_v62, %v417_v28  ;;  %v161_v5 = vsub.f32 1.0, %v262_v62  ;;  %vm168_vm4 = vcmp.gt.f32.partialorder %v152_v61, 0.5 }
  0x2d   :  { %v263_v9 = vsel %vm168_vm4, 1.0, %v304_v31 }
  0x2e   :  { %v128_v7 = vmul.f32 %v127_v60, %v91_v63  ;;  %v165_v8 = vrot.slane %v161_v5, %v417_v28  ;;  %v220_v10 = vsel %vm198_vm5, %v263_v9, 0.0  ;;  %v160_v11 = vmul.f32 %v159_v4, %v155_v6 }
  0x2f   :  { %221 = vadd.xlane.f32.xlu1 %v220_v10  ;;  %v173_v12 = vmul.f32 %v263_v9, %v412_v2  ;;  %v196_v25 = vrot.slane %v263_v9, %v417_v28 }
  0x30   :  { %v129_v0 = vadd.f32 %v128_v7, %v122_v59 }
  0x31   :  { %v174_v1 = vsub.f32 %v172_v3, %v173_v12 }
  0x32   :  { %v166_v13 = vmul.f32 %v165_v8, %v129_v0 }
  0x34   :  { %v167_v15 = vadd.f32 %v166_v13, %v160_v11  ;;  %v287_v17 = vpop.eup %286 }
  0x35   :  { %v181_v20 = vmul.f32 0.6931472, %v287_v17 }
  0x36   :  { %v185_v19 = vsub.f32 %v167_v15, %v184_v14 }
  0x37   :  { %v182_v22 = vadd.f32 %v181_v20, %v174_v1 }
  0x38   :  { %v186_v21 = vsub.f32 %v183_v16, %v185_v19 }
  0x39   :  { %v199_v2 = vsel %vm198_vm5, %v182_v22, 0.0 }
  0x3a   :  { %v187_v23 = vand.u32 2147483647, %v186_v21  ;;  %v189_v24 = vmul.f32 0.5, %v186_v21  ;;  %200 = vadd.xlane.f32.xlu0 %v199_v2 }
  0x3c   :  { %vm188_vm6 = vcmp.lt.f32.partialorder %v187_v23, 1.0  ;;  %v190_v26 = vmul.f32 %v189_v24, %v186_v21  ;;  %v264_v27 = vadd.f32 -0.5, %v187_v23 }
  0x3e   :  { %v192_v29 = vsel %vm188_vm6, %v190_v26, %v264_v27 }
  0x3f   :  { %v197_v30 = vmul.f32 %v196_v25, %v192_v29 }
  0x41   :  { %v210_v31 = vsel %vm209_vm7, %v197_v30, 0.0 }
  0x42   :  { %211 = vadd.xlane.f32.xlu0 %v210_v31 }
  0xb8   :  { %v222_v18 = vpop.xlane.xlu1 %221 }
  0xb9   :  { %v223_v32 = vrot.slane %v222_v18, 4 }
  0xbb   :  { %v224_v35 = vadd.f32 %v223_v32, %v222_v18 }
  0xbd   :  { %v225_v38 = vrot.slane %v224_v35, 2 }
  0xbf   :  { %v226_v43 = vadd.f32 %v225_v38, %v224_v35 }
  0xc1   :  { %v227_v47 = vrot.slane %v226_v43, 1 }
  0xc3   :  { %v201_v33 = vpop.xlane.xlu0 %200  ;;  %v228_v50 = vadd.f32 %v227_v47, %v226_v43 }
  0xc4   :  { %v202_v34 = vrot.slane %v201_v33, 4 }
  0xc6   :  { %v203_v36 = vadd.f32 %v202_v34, %v201_v33 }
  0xc8   :  { %v204_v37 = vrot.slane %v203_v36, 2 }
  0xca   :  { %v205_v28 = vadd.f32 %v204_v37, %v203_v36 }
  0xcb   :  { %v212_v39 = vpop.xlane.xlu0 %211 }
  0xcc   :  { %v213_v40 = vrot.slane %v212_v39, 4  ;;  %v206_v42 = vrot.slane %v205_v28, 1 }
  0xce   :  { %v214_v41 = vadd.f32 %v213_v40, %v212_v39  ;;  %v207_v45 = vadd.f32 %v206_v42, %v205_v28 }
  0xd0   :  { %v215_v44 = vrot.slane %v214_v41, 2  ;;  %265 = vpush %v207_v45 }
  0xd2   :  { %v216_v46 = vadd.f32 %v215_v44, %v214_v41 }
  0xd4   :  { %v217_v48 = vrot.slane %v216_v46, 1 }
  0xd6   :  { %v218_v49 = vadd.f32 %v217_v48, %v216_v46 }
  0xd8   :  { %267 = vpush %v218_v49 }
  0xd9   :  { %269 = vpush %v228_v50 }
 0x101   :  { %s266_s0 = spop %265 }
 0x102   :  { %s230_s2 = smul.f32 0.0078125, %s266_s0 }
 0x104   :  { %241 = sst [smem:[#allocation2]] %s230_s2 }
 0x109   :  { %s268_s3 = spop %267 }
 0x10a   :  { %s270_s4 = spop %269 }
 0x10b   :  { %s232_s5 = smul.f32 4.0, %s270_s4  ;;  %p231_p0 = scmp.gt.f32.partialorder %s270_s4, 0.0 }
 0x10d   :  { %s233_s7 = smax.f32 %s305_s6, %s232_s5 }
 0x10e   :  { %v234_v51 = vstv %s233_s7 }
 0x10f   :  { %288 = vrcp.f32 %v234_v51 }
 0x11c   :  { %v289_v52 = vpop.eup %288 }
 0x11d   :  { %271 = vpush %v289_v52 }
 0x14e   :  { %s272_s8 = spop %271 }
 0x14f   :  { %s237_s9 = smul.f32 %s272_s8, %s268_s3 }
 0x151   :  { %s456_s9 = smov (!%p231_p0, %s237_s9), 0.0 }
 0x152   :  { %s239_s13 = smul.f32 0.25, %s456_s9 }
 0x154   :  { %243 = sst [smem:[#allocation2 + $0x1]] %s239_s13 }
 0x155   :  { %301 = shalt.err (!%p298_p5)
}
 0x156   :  { %s306_s15 = smov [#allocation2]  }
 0x157   :  { %253 = dma.smem_to_vmem %s306_s15, 16, %s251_s12, [#allocation3]  }
 0x158   :  { %302 = dma.done.wait [#allocation3], 16  }
 0x159   :  { %303 = vsyncadd [#allocation3], 4294967280 }
 0x15a   :  { %257 = sfence }
 0x15b   :  { %258 = vsyncpa [#allocation3], 1 }

</bundles_post_ra>
